<compile_context>
chip_gen: v7x
topology: tpu7x:2x2x1
jax: 0.10.0
libtpu: 0.0.40
codegen_flags: <defaults>
</compile_context>

<pallas_src>
import jax
import jax.numpy as jnp
from jax.experimental import pallas as pl
from jax.experimental.pallas import tpu as pltpu


def mlp_kernel(h_ref, t_ref, w1a_ref, w1b_ref, w1c_ref, w1d_ref, b1_ref,
               w2_ref, b2_ref, o_ref):
    h = h_ref[...]
    t = t_ref[...]

    # linear1 without materializing concat([h, t, |h-t|, h*t]):
    # four MXU pushes accumulated into one f32 tile.
    z1 = jnp.dot(h, w1a_ref[...], preferred_element_type=jnp.float32)
    z1 = z1 + jnp.dot(t, w1b_ref[...], preferred_element_type=jnp.float32)
    z1 = z1 + jnp.dot(jnp.abs(h - t), w1c_ref[...],
                      preferred_element_type=jnp.float32)
    z1 = z1 + jnp.dot(h * t, w1d_ref[...],
                      preferred_element_type=jnp.float32)
    z1 = z1 + b1_ref[...]                       # bias broadcast (1, 2*hs)

    a1 = jnp.maximum(z1, 0.0)                   # ReLU (dropout == identity in eval)

    out = jnp.dot(a1, w2_ref[...], preferred_element_type=jnp.float32) + b2_ref[...]
    o_ref[...] = out.astype(o_ref.dtype)


def _round_up(x, m):
    return ((x + m - 1) // m) * m


def mlp_pallas(head_rep, tail_rep, w1, b1, w2, b2, *, tile_n=512):
    n, indim = head_rep.shape
    hid = w1.shape[1]          # 2 * hs
    outdim = w2.shape[1]

    # --- lane-pad the output dim to a multiple of 128 (unmasked stores) ---
    out_pad = _round_up(max(outdim, 128), 128)
    if out_pad != outdim:
        w2p = jnp.pad(w2, ((0, 0), (0, out_pad - outdim)))
        b2p = jnp.pad(b2, ((0, 0), (0, out_pad - outdim)))
    else:
        w2p, b2p = w2, b2

    # --- split W1 into the four static row blocks matching [h, t, |h-t|, h*t] ---
    w1a = w1[0 * indim:1 * indim]
    w1b = w1[1 * indim:2 * indim]
    w1c = w1[2 * indim:3 * indim]
    w1d = w1[3 * indim:4 * indim]

    # --- row tile: multiple of 8 (sublane), capped for small N; pad N if needed ---
    tile_n = min(tile_n, max(8, _round_up(n, 8)))
    n_pad = _round_up(n, tile_n)
    if n_pad != n:
        head_rep = jnp.pad(head_rep, ((0, n_pad - n), (0, 0)))
        tail_rep = jnp.pad(tail_rep, ((0, n_pad - n), (0, 0)))

    grid = (n_pad // tile_n,)

    row_spec = pl.BlockSpec((tile_n, indim), lambda i: (i, 0))
    const = lambda shape: pl.BlockSpec(shape, lambda i: (0, 0))

    flops = 2 * n_pad * (4 * indim * hid + hid * out_pad)
    bytes_accessed = 4 * (2 * n_pad * indim          # activations in
                          + n_pad * out_pad          # output
                          + 4 * indim * hid + hid    # W1 + b1
                          + hid * out_pad + out_pad) # W2 + b2

    out = pl.pallas_call(
        mlp_kernel,
        out_shape=jax.ShapeDtypeStruct((n_pad, out_pad), jnp.float32),
        grid=grid,
        in_specs=[
            row_spec,                # head_rep tile
            row_spec,                # tail_rep tile
            const(w1a.shape),        # W1 blocks: resident across grid steps
            const(w1b.shape),
            const(w1c.shape),
            const(w1d.shape),
            const(b1.shape),
            const(w2p.shape),
            const(b2p.shape),
        ],
        out_specs=pl.BlockSpec((tile_n, out_pad), lambda i: (i, 0)),
        compiler_params=pltpu.CompilerParams(
            dimension_semantics=("parallel",),      # independent row tiles (v7x 2 TCs)
            vmem_limit_bytes=32 * 1024 * 1024,
        ),
        cost_estimate=pl.CostEstimate(
            flops=flops, transcendentals=0, bytes_accessed=bytes_accessed),
    )(head_rep, tail_rep, w1a, w1b, w1c, w1d, b1, w2p, b2p)

    # Strip row / lane padding outside the kernel.
    return out[:n, :outdim]


def mlp_reference(head_rep, tail_rep, w1, b1, w2, b2):
    feats = jnp.concatenate(
        [head_rep, tail_rep, jnp.abs(head_rep - tail_rep), head_rep * tail_rep],
        axis=-1)
    h = jax.nn.relu(feats @ w1 + b1)
    return h @ w2 + b2


def init_linear(key, fan_in, fan_out):
    # PyTorch nn.Linear default init: U(-1/sqrt(fan_in), 1/sqrt(fan_in))
    kw, kb = jax.random.split(key)
    bound = 1.0 / jnp.sqrt(jnp.float32(fan_in))
    w = jax.random.uniform(kw, (fan_in, fan_out), jnp.float32, -bound, bound)
    b = jax.random.uniform(kb, (1, fan_out), jnp.float32, -bound, bound)
    return w, b


if __name__ == "__main__":
    # Small shapes consistent with the module:
    #   head_rep/tail_rep: (N, indim); linear1: 4*indim -> 2*hs; linear2: 2*hs -> outdim
    N, indim, hs, outdim = 8, 32, 64, 16

    key = jax.random.PRNGKey(0)
    k_h, k_t, k_l1, k_l2 = jax.random.split(key, 4)

    head_rep = jax.random.normal(k_h, (N, indim), jnp.float32)
    tail_rep = jax.random.normal(k_t, (N, indim), jnp.float32)

    w1, b1 = init_linear(k_l1, 4 * indim, 2 * hs)   # (128, 128), (1, 128)
    w2, b2 = init_linear(k_l2, 2 * hs, outdim)      # (128, 16),  (1, 16)

    out = mlp_pallas(head_rep, tail_rep, w1, b1, w2, b2)
    out = jax.block_until_ready(out)

    ref = mlp_reference(head_rep, tail_rep, w1, b1, w2, b2)
    assert out.shape == (N, outdim)
    assert jnp.allclose(out, ref, atol=1e-4, rtol=1e-4), "mismatch vs JAX reference"

    print("KERNEL_OK")
</pallas_src>

<mosaic_0001>
module attributes {stable_mosaic.version = 11 : i64} {
  func.func @mlp_kernel(%arg0: i32, %arg1: memref<8x32xf32, #tpu.memory_space<vmem>>, %arg2: memref<8x32xf32, #tpu.memory_space<vmem>>, %arg3: memref<32x128xf32, #tpu.memory_space<vmem>>, %arg4: memref<32x128xf32, #tpu.memory_space<vmem>>, %arg5: memref<32x128xf32, #tpu.memory_space<vmem>>, %arg6: memref<32x128xf32, #tpu.memory_space<vmem>>, %arg7: memref<1x128xf32, #tpu.memory_space<vmem>>, %arg8: memref<128x128xf32, #tpu.memory_space<vmem>>, %arg9: memref<1x128xf32, #tpu.memory_space<vmem>>, %arg10: memref<8x128xf32, #tpu.memory_space<vmem>>) attributes {dimension_semantics = [#tpu.dimension_semantics<parallel>], iteration_bounds = array<i64: 1>, scalar_prefetch = 0 : i64, scratch_operands = 0 : i64, tpu.core_type = #tpu.core_type<tc>, window_params = [{transform_indices = @transform_0, window_bounds = array<i64: 8, 32>}, {transform_indices = @transform_1, window_bounds = array<i64: 8, 32>}, {pipeline_mode = #tpu.pipeline_mode<synchronous>, transform_indices = @transform_2, window_bounds = array<i64: 32, 128>}, {pipeline_mode = #tpu.pipeline_mode<synchronous>, transform_indices = @transform_3, window_bounds = array<i64: 32, 128>}, {pipeline_mode = #tpu.pipeline_mode<synchronous>, transform_indices = @transform_4, window_bounds = array<i64: 32, 128>}, {pipeline_mode = #tpu.pipeline_mode<synchronous>, transform_indices = @transform_5, window_bounds = array<i64: 32, 128>}, {pipeline_mode = #tpu.pipeline_mode<synchronous>, transform_indices = @transform_6, window_bounds = array<i64: 1, 128>}, {pipeline_mode = #tpu.pipeline_mode<synchronous>, transform_indices = @transform_7, window_bounds = array<i64: 128, 128>}, {pipeline_mode = #tpu.pipeline_mode<synchronous>, transform_indices = @transform_8, window_bounds = array<i64: 1, 128>}, {transform_indices = @transform_9, window_bounds = array<i64: 8, 128>}]} {
    %c0 = arith.constant 0 : index
    %c0_0 = arith.constant 0 : index
    %0 = vector.load %arg1[%c0, %c0_0] : memref<8x32xf32, #tpu.memory_space<vmem>>, vector<8x32xf32>
    %c0_1 = arith.constant 0 : index
    %c0_2 = arith.constant 0 : index
    %1 = vector.load %arg2[%c0_1, %c0_2] : memref<8x32xf32, #tpu.memory_space<vmem>>, vector<8x32xf32>
    %c0_3 = arith.constant 0 : index
    %c0_4 = arith.constant 0 : index
    %2 = vector.load %arg3[%c0_3, %c0_4] : memref<32x128xf32, #tpu.memory_space<vmem>>, vector<32x128xf32>
    %cst = arith.constant dense<0.000000e+00> : vector<8x128xf32>
    %3 = tpu.matmul %0, %2, %cst {dimension_numbers = #tpu.dot_dimension_numbers<[1], [0], [0], [1], [0, 0, 1, 1], [], []>} : vector<8x32xf32>, vector<32x128xf32>, vector<8x128xf32> -> vector<8x128xf32>
    %c0_5 = arith.constant 0 : index
    %c0_6 = arith.constant 0 : index
    %4 = vector.load %arg4[%c0_5, %c0_6] : memref<32x128xf32, #tpu.memory_space<vmem>>, vector<32x128xf32>
    %cst_7 = arith.constant dense<0.000000e+00> : vector<8x128xf32>
    %5 = tpu.matmul %1, %4, %cst_7 {dimension_numbers = #tpu.dot_dimension_numbers<[1], [0], [0], [1], [0, 0, 1, 1], [], []>} : vector<8x32xf32>, vector<32x128xf32>, vector<8x128xf32> -> vector<8x128xf32>
    %6 = arith.addf %3, %5 : vector<8x128xf32>
    %7 = arith.subf %0, %1 : vector<8x32xf32>
    %8 = math.absf %7 : vector<8x32xf32>
    %c0_8 = arith.constant 0 : index
    %c0_9 = arith.constant 0 : index
    %9 = vector.load %arg5[%c0_8, %c0_9] : memref<32x128xf32, #tpu.memory_space<vmem>>, vector<32x128xf32>
    %cst_10 = arith.constant dense<0.000000e+00> : vector<8x128xf32>
    %10 = tpu.matmul %8, %9, %cst_10 {dimension_numbers = #tpu.dot_dimension_numbers<[1], [0], [0], [1], [0, 0, 1, 1], [], []>} : vector<8x32xf32>, vector<32x128xf32>, vector<8x128xf32> -> vector<8x128xf32>
    %11 = arith.addf %6, %10 : vector<8x128xf32>
    %12 = arith.mulf %0, %1 : vector<8x32xf32>
    %c0_11 = arith.constant 0 : index
    %c0_12 = arith.constant 0 : index
    %13 = vector.load %arg6[%c0_11, %c0_12] : memref<32x128xf32, #tpu.memory_space<vmem>>, vector<32x128xf32>
    %cst_13 = arith.constant dense<0.000000e+00> : vector<8x128xf32>
    %14 = tpu.matmul %12, %13, %cst_13 {dimension_numbers = #tpu.dot_dimension_numbers<[1], [0], [0], [1], [0, 0, 1, 1], [], []>} : vector<8x32xf32>, vector<32x128xf32>, vector<8x128xf32> -> vector<8x128xf32>
    %15 = arith.addf %11, %14 : vector<8x128xf32>
    %c0_14 = arith.constant 0 : index
    %c0_15 = arith.constant 0 : index
    %16 = vector.load %arg7[%c0_14, %c0_15] : memref<1x128xf32, #tpu.memory_space<vmem>>, vector<1x128xf32>
    %17 = vector.broadcast %16 : vector<1x128xf32> to vector<8x128xf32>
    %18 = arith.addf %15, %17 : vector<8x128xf32>
    %cst_16 = arith.constant 0.000000e+00 : f32
    %19 = vector.broadcast %cst_16 : f32 to vector<8x128xf32>
    %20 = arith.maximumf %18, %19 : vector<8x128xf32>
    %c0_17 = arith.constant 0 : index
    %c0_18 = arith.constant 0 : index
    %21 = vector.load %arg8[%c0_17, %c0_18] : memref<128x128xf32, #tpu.memory_space<vmem>>, vector<128x128xf32>
    %cst_19 = arith.constant dense<0.000000e+00> : vector<8x128xf32>
    %22 = tpu.matmul %20, %21, %cst_19 {dimension_numbers = #tpu.dot_dimension_numbers<[1], [0], [0], [1], [0, 0, 1, 1], [], []>} : vector<8x128xf32>, vector<128x128xf32>, vector<8x128xf32> -> vector<8x128xf32>
    %c0_20 = arith.constant 0 : index
    %c0_21 = arith.constant 0 : index
    %23 = vector.load %arg9[%c0_20, %c0_21] : memref<1x128xf32, #tpu.memory_space<vmem>>, vector<1x128xf32>
    %24 = vector.broadcast %23 : vector<1x128xf32> to vector<8x128xf32>
    %25 = arith.addf %22, %24 : vector<8x128xf32>
    %c0_22 = arith.constant 0 : index
    %c0_23 = arith.constant 0 : index
    %26 = vector.load %arg10[%c0_22, %c0_23] : memref<8x128xf32, #tpu.memory_space<vmem>>, vector<8x128xf32>
    tpu.vector_store %arg10[%c0_22, %c0_23], %25 {strides = array<i32>} : memref<8x128xf32, #tpu.memory_space<vmem>>, vector<8x128xf32>,
    return
  }
  func.func @transform_0(%arg0: i32) -> (i32, i32) {
    %c0_i32 = arith.constant 0 : i32
    %c0_i32_0 = arith.constant 0 : i32
    return %arg0, %c0_i32 : i32, i32
  }
  func.func @transform_1(%arg0: i32) -> (i32, i32) {
    %c0_i32 = arith.constant 0 : i32
    %c0_i32_0 = arith.constant 0 : i32
    return %arg0, %c0_i32 : i32, i32
  }
  func.func @transform_2(%arg0: i32) -> (i32, i32) {
    %c0_i32 = arith.constant 0 : i32
    %c0_i32_0 = arith.constant 0 : i32
    %c0_i32_1 = arith.constant 0 : i32
    return %c0_i32, %c0_i32_0 : i32, i32
  }
  func.func @transform_3(%arg0: i32) -> (i32, i32) {
    %c0_i32 = arith.constant 0 : i32
    %c0_i32_0 = arith.constant 0 : i32
    %c0_i32_1 = arith.constant 0 : i32
    return %c0_i32, %c0_i32_0 : i32, i32
  }
  func.func @transform_4(%arg0: i32) -> (i32, i32) {
    %c0_i32 = arith.constant 0 : i32
    %c0_i32_0 = arith.constant 0 : i32
    %c0_i32_1 = arith.constant 0 : i32
    return %c0_i32, %c0_i32_0 : i32, i32
  }
  func.func @transform_5(%arg0: i32) -> (i32, i32) {
    %c0_i32 = arith.constant 0 : i32
    %c0_i32_0 = arith.constant 0 : i32
    %c0_i32_1 = arith.constant 0 : i32
    return %c0_i32, %c0_i32_0 : i32, i32
  }
  func.func @transform_6(%arg0: i32) -> (i32, i32) {
    %c0_i32 = arith.constant 0 : i32
    %c0_i32_0 = arith.constant 0 : i32
    %c0_i32_1 = arith.constant 0 : i32
    return %c0_i32, %c0_i32_0 : i32, i32
  }
  func.func @transform_7(%arg0: i32) -> (i32, i32) {
    %c0_i32 = arith.constant 0 : i32
    %c0_i32_0 = arith.constant 0 : i32
    %c0_i32_1 = arith.constant 0 : i32
    return %c0_i32, %c0_i32_0 : i32, i32
  }
  func.func @transform_8(%arg0: i32) -> (i32, i32) {
    %c0_i32 = arith.constant 0 : i32
    %c0_i32_0 = arith.constant 0 : i32
    %c0_i32_1 = arith.constant 0 : i32
    return %c0_i32, %c0_i32_0 : i32, i32
  }
  func.func @transform_9(%arg0: i32) -> (i32, i32) {
    %c0_i32 = arith.constant 0 : i32
    %c0_i32_0 = arith.constant 0 : i32
    return %arg0, %c0_i32 : i32, i32
  }
}

</mosaic_0001>

<bundles_post_ra>
// kernel: tpu_custom_call.1
= control target key start
LH: loop header
LB: loop body
LE: loop exit
PB: predicated region body
PF: predicated region fallthrough
CT: control target
= control target key end

     0   :  { %14 = vsyncpa [#allocation3], 0  ;;  %s1135_s0 = inlined_call_operand.hbm [shape: f32[8,32], index: 0, kind: input, shape index: {}]   ;;  %s1136_s1 = inlined_call_operand.hbm [shape: f32[8,32], index: 1, kind: input, shape index: {}]   ;;  %s1137_s2 = inlined_call_operand.hbm [shape: f32[32,128], index: 2, kind: input, shape index: {}]   ;;  %s1138_s3 = inlined_call_operand.hbm [shape: f32[32,128], index: 3, kind: input, shape index: {}]   ;;  %s1139_s4 = inlined_call_operand.hbm [shape: f32[32,128], index: 4, kind: input, shape index: {}]   ;;  %s1140_s5 = inlined_call_operand.hbm [shape: f32[32,128], index: 5, kind: input, shape index: {}]   ;;  %s1141_s6 = inlined_call_operand.vmem [shape: f32[1,128], index: 6, kind: input, shape index: {}]   ;;  %s1142_s7 = inlined_call_operand.hbm [shape: f32[128,128], index: 7, kind: input, shape index: {}]   ;;  %s1143_s8 = inlined_call_operand.vmem [shape: f32[1,128], index: 8, kind: input, shape index: {}]   ;;  %s1144_s9 = inlined_call_operand.hbm [shape: f32[8,128], index: 9, kind: output, shape index: {}]  }
   0x1   :  { %15 = vsyncpa [#allocation6], 0 }
   0x2   :  { %16 = vsyncpa [#allocation9], 0 }
   0x3   :  { %17 = vsyncpa [#allocation12], 0 }
   0x4   :  { %18 = vsyncpa [#allocation4], 0  ;;  %s930_s30 = smov [#allocation5]   ;;  %s744_s13 = scalar_lea.hbm %s1136_s1, 128 }
   0x5   :  { %s35_s10 = sshll.u32 %s930_s30, 4  ;;  %p745_p0 = scmp.ne.s32.totalorder %s1136_s1, %s744_s13  ;;  %s36_s10 = int_to_ptr.vmem [resolvable:$true] %s35_s10 }
   0x6   :  { %p748_p1 = scmp.lt.u32.totalorder %s744_s13, %s1136_s1 }
   0x8   :  { %p750_p2 = pnand %p748_p1, %p745_p0 }
   0xa   :  { %753 = shalt.err (!%p750_p2)
}
   0xb   :  { %s754_s18 = scalar_lea.vmem %s36_s10, 128  ;;  %p759_p4 = scmp.lt.s32.totalorder %s36_s10, %s36_s10 }
   0xc   :  { %p755_p3 = scmp.ne.s32.totalorder %s36_s10, %s754_s18  ;;  %p760_p5 = scmp.lt.s32.totalorder %s754_s18, %s754_s18 }
   0xe   :  { %p761_p6 = por %p760_p5, %p759_p4 }
  0x10   :  { %p762_p7 = pnand %p761_p6, %p755_p3 }
  0x12   :  { %765 = shalt.err (!%p762_p7)
}
  0x13   :  { %38 = dma.hbm_to_vmem [thread:$0]  %s1136_s1, 128, %s36_s10, [#allocation6]  }
  0x14   :  { %s931_s21 = smov [#allocation8]   ;;  %s932_s23 = smov [#allocation11]  }
  0x15   :  { %s56_s22 = sshll.u32 %s931_s21, 4  ;;  %s80_s24 = sshll.u32 %s932_s23, 4  ;;  %s57_s22 = int_to_ptr.vmem [resolvable:$true] %s56_s22  ;;  %s81_s24 = int_to_ptr.vmem [resolvable:$true] %s80_s24 }
  0x16   :  { %s766_s27 = scalar_lea.hbm %s1138_s3, 512 }
  0x17   :  { %p767_p8 = scmp.ne.s32.totalorder %s1138_s3, %s766_s27  ;;  %p770_p9 = scmp.lt.u32.totalorder %s766_s27, %s1138_s3 }
  0x19   :  { %p772_p10 = pnand %p770_p9, %p767_p8 }
  0x1b   :  { %775 = shalt.err (!%p772_p10)
}
  0x1c   :  { %s776_s1 = scalar_lea.vmem %s57_s22, 512  ;;  %p781_p12 = scmp.lt.s32.totalorder %s57_s22, %s57_s22 }
  0x1d   :  { %p777_p11 = scmp.ne.s32.totalorder %s57_s22, %s776_s1  ;;  %p782_p13 = scmp.lt.s32.totalorder %s776_s1, %s776_s1 }
  0x1f   :  { %p783_p0 = por %p782_p13, %p781_p12 }
  0x21   :  { %p784_p1 = pnand %p783_p0, %p777_p11 }
  0x23   :  { %787 = shalt.err (!%p784_p1)
}
  0x24   :  { %s933_s10 = smov 128   ;;  %s934_s12 = smov 8  }
  0x25   :  { %62 = dma.hbm_to_vmem [thread:$0]  %s1138_s3, 512, %s57_s22, [#allocation9], %s933_s10, %s933_s10, %s934_s12  }
  0x26   :  { %s788_s17 = scalar_lea.hbm %s1140_s5, 512 }
  0x27   :  { %p789_p2 = scmp.ne.s32.totalorder %s1140_s5, %s788_s17  ;;  %p792_p3 = scmp.lt.u32.totalorder %s788_s17, %s1140_s5 }
  0x29   :  { %p794_p4 = pnand %p792_p3, %p789_p2 }
  0x2b   :  { %797 = shalt.err (!%p794_p4)
}
  0x2c   :  { %s798_s23 = scalar_lea.vmem %s81_s24, 512  ;;  %p803_p6 = scmp.lt.s32.totalorder %s81_s24, %s81_s24 }
  0x2d   :  { %p799_p5 = scmp.ne.s32.totalorder %s81_s24, %s798_s23  ;;  %p804_p7 = scmp.lt.s32.totalorder %s798_s23, %s798_s23 }
  0x2f   :  { %p805_p8 = por %p804_p7, %p803_p6 }
  0x31   :  { %p806_p9 = pnand %p805_p8, %p799_p5 }
  0x33   :  { %809 = shalt.err (!%p806_p9)
}
  0x34   :  { %86 = dma.hbm_to_vmem [thread:$0]  %s1140_s5, 512, %s81_s24, [#allocation12], %s933_s10, %s933_s10, %s934_s12  }
  0x35   :  { %s935_s25 = smov [#allocation2]   ;;  %s936_s27 = smov [#allocation7]  }
  0x36   :  { %s25_s26 = sshll.u32 %s935_s25, 4  ;;  %s44_s28 = sshll.u32 %s936_s27, 4  ;;  %s26_s26 = int_to_ptr.vmem [resolvable:$true] %s25_s26  ;;  %s45_s28 = int_to_ptr.vmem [resolvable:$true] %s44_s28 }
  0x37   :  { %s810_s11 = scalar_lea.hbm %s1135_s0, 128 }
  0x38   :  { %p811_p10 = scmp.ne.s32.totalorder %s1135_s0, %s810_s11  ;;  %p814_p11 = scmp.lt.u32.totalorder %s810_s11, %s1135_s0 }
  0x3a   :  { %p816_p12 = pnand %p814_p11, %p811_p10 }
  0x3c   :  { %819 = shalt.err (!%p816_p12)
}
  0x3d   :  { %s820_s5 = scalar_lea.vmem %s26_s26, 128  ;;  %p825_p0 = scmp.lt.s32.totalorder %s26_s26, %s26_s26 }
  0x3e   :  { %p821_p13 = scmp.ne.s32.totalorder %s26_s26, %s820_s5  ;;  %p826_p1 = scmp.lt.s32.totalorder %s820_s5, %s820_s5 }
  0x40   :  { %p827_p2 = por %p826_p1, %p825_p0 }
  0x42   :  { %p828_p3 = pnand %p827_p2, %p821_p13 }
  0x44   :  { %831 = shalt.err (!%p828_p3)
}
  0x45   :  { %28 = dma.hbm_to_vmem [thread:$0]  %s1135_s0, 128, %s26_s26, [#allocation3]  }
  0x46   :  { %s832_s19 = scalar_lea.hbm %s1137_s2, 512 }
  0x47   :  { %p833_p4 = scmp.ne.s32.totalorder %s1137_s2, %s832_s19  ;;  %p836_p5 = scmp.lt.u32.totalorder %s832_s19, %s1137_s2 }
  0x49   :  { %p838_p6 = pnand %p836_p5, %p833_p4 }
  0x4b   :  { %841 = shalt.err (!%p838_p6)
}
  0x4c   :  { %s842_s22 = scalar_lea.vmem %s45_s28, 512  ;;  %p847_p8 = scmp.lt.s32.totalorder %s45_s28, %s45_s28 }
  0x4d   :  { %p843_p7 = scmp.ne.s32.totalorder %s45_s28, %s842_s22  ;;  %p848_p9 = scmp.lt.s32.totalorder %s842_s22, %s842_s22 }
  0x4f   :  { %p849_p10 = por %p848_p9, %p847_p8 }
  0x51   :  { %p850_p11 = pnand %p849_p10, %p843_p7 }
  0x53   :  { %853 = shalt.err (!%p850_p11)
}
  0x54   :  { %50 = dma.hbm_to_vmem [thread:$0]  %s1137_s2, 512, %s45_s28, [#allocation6], %s933_s10, %s933_s10, %s934_s12  }
  0x55   :  { %s937_s26 = smov [#allocation10]   ;;  %s938_s29 = smov [#allocation13]  }
  0x56   :  { %s68_s27 = sshll.u32 %s937_s26, 4  ;;  %s94_s30 = sshll.u32 %s938_s29, 4  ;;  %s69_s27 = int_to_ptr.vmem [resolvable:$true] %s68_s27  ;;  %s95_s30 = int_to_ptr.vmem [resolvable:$true] %s94_s30 }
  0x57   :  { %s854_s13 = scalar_lea.hbm %s1139_s4, 512 }
  0x58   :  { %p855_p12 = scmp.ne.s32.totalorder %s1139_s4, %s854_s13  ;;  %p858_p13 = scmp.lt.u32.totalorder %s854_s13, %s1139_s4 }
  0x5a   :  { %p860_p0 = pnand %p858_p13, %p855_p12 }
  0x5c   :  { %863 = shalt.err (!%p860_p0)
}
  0x5d   :  { %s864_s2 = scalar_lea.vmem %s69_s27, 512  ;;  %p869_p2 = scmp.lt.s32.totalorder %s69_s27, %s69_s27 }
  0x5e   :  { %p865_p1 = scmp.ne.s32.totalorder %s69_s27, %s864_s2  ;;  %p870_p3 = scmp.lt.s32.totalorder %s864_s2, %s864_s2 }
  0x60   :  { %p871_p4 = por %p870_p3, %p869_p2 }
  0x62   :  { %p872_p5 = pnand %p871_p4, %p865_p1 }
  0x64   :  { %875 = shalt.err (!%p872_p5)
}
  0x65   :  { %74 = dma.hbm_to_vmem [thread:$0]  %s1139_s4, 512, %s69_s27, [#allocation9], %s933_s10, %s933_s10, %s934_s12  }
  0x66   :  { %s876_s19 = scalar_lea.hbm %s1142_s7, 2048 }
  0x67   :  { %p877_p6 = scmp.ne.s32.totalorder %s1142_s7, %s876_s19  ;;  %p880_p7 = scmp.lt.u32.totalorder %s876_s19, %s1142_s7 }
  0x69   :  { %p882_p8 = pnand %p880_p7, %p877_p6 }
  0x6b   :  { %885 = shalt.err (!%p882_p8)
}
  0x6c   :  { %s886_s22 = scalar_lea.vmem %s95_s30, 2048  ;;  %p891_p10 = scmp.lt.s32.totalorder %s95_s30, %s95_s30 }
  0x6d   :  { %p887_p9 = scmp.ne.s32.totalorder %s95_s30, %s886_s22  ;;  %p892_p11 = scmp.lt.s32.totalorder %s886_s22, %s886_s22 }
  0x6f   :  { %p893_p12 = por %p892_p11, %p891_p10 }
  0x71   :  { %p894_p13 = pnand %p893_p12, %p887_p9 }
  0x73   :  { %897 = shalt.err (!%p894_p13)
}
  0x74   :  { %100 = dma.hbm_to_vmem [thread:$0]  %s1142_s7, 2048, %s95_s30, [#allocation12], %s933_s10, %s933_s10, %s934_s12  }
  0x75   :  { %920 = dma.done.wait [#allocation3], 128  }
  0x76   :  { %921 = vsyncadd [#allocation3], 4294967168 }
  0x77   :  { %922 = dma.done.wait [#allocation6], 640  }
  0x78   :  { %923 = vsyncadd [#allocation6], 4294966656 }
  0x79   :  { %924 = dma.done.wait [#allocation9], 1024  }
  0x7a   :  { %925 = vsyncadd [#allocation9], 4294966272 }
  0x7b   :  { %926 = dma.done.wait [#allocation12], 2560  }
  0x7c   :  { %927 = vsyncadd [#allocation12], 4294964736  ;;  %v939_v0 = vmov 0.0|0.0   ;;  %vm940_vm0 = vmmov 0   ;;  %v941_v1 = vmov 0.0   ;;  %v130_v2 = vld [vmem:[#allocation8] sm:$0xff] }
  0x7d   :  { %683 = vmatprep.subr.bf16.mxu1 %v939_v0  ;;  %612 = vmatprep.mubr.msk.f32.mxu1 %vm940_vm0, %v941_v1  ;;  %v131_v3 = vld [vmem:[#allocation8 + $0x8] sm:$0xff]  ;;  %v132_v4 = vld [vmem:[#allocation8 + $0x10] sm:$0xff]  ;;  %v133_v6 = vld [vmem:[#allocation8 + $0x18] sm:$0xff]  ;;  %vm134_vm1 = vcmask 261120   ;;  %s942_s26 = smov [#allocation14]  }
  0x7e   :  { %707 = vmatprep.subr.bf16.mxu0 %v939_v0  ;;  %680 = vmatprep.mubr.msk.f32.mxu0 %vm940_vm0, %v941_v1  ;;  %v684_v5 = vpack.c.bf16 %v131_v3, %v130_v2  ;;  %v687_v7 = vpack.c.bf16 %v133_v6, %v132_v4  ;;  %v126_v8 = vld [vmem:[#allocation7] sm:$0xff]  ;;  %v127_v9 = vld [vmem:[#allocation7 + $0x8] sm:$0xff]  ;;  %v125_v10 = vld [vmem:[#allocation5] sm:$0xff]  ;;  %s549_s27 = sshll.u32 %s942_s26, 4  ;;  %s550_s27 = int_to_ptr.vmem [resolvable:$true] %s549_s27 }
  0x7f   :  { %v690_v11 = vpack.c.bf16 %v127_v9, %v126_v8  ;;  %v128_v12 = vld [vmem:[#allocation7 + $0x10] sm:$0xff]  ;;  %v129_v13 = vld [vmem:[#allocation7 + $0x18] sm:$0xff]  ;;  %v283_v15 = vld [vmem:[#allocation10] sm:$0xff]  ;;  %s898_s29 = scalar_lea.vmem %s550_s27, 128  ;;  %p903_p1 = scmp.lt.s32.totalorder %s550_s27, %s550_s27 }
  0x80   :  { %685 = vmatpush3.bf16.msra.mxu1 %v684_v5  ;;  %v693_v14 = vpack.c.bf16 %v129_v13, %v128_v12  ;;  %v284_v16 = vld [vmem:[#allocation10 + $0x8] sm:$0xff]  ;;  %v124_v17 = vld [vmem:[#allocation2] sm:$0xff]  ;;  %v286_v20 = vld [vmem:[#allocation10 + $0x18] sm:$0xff]  ;;  %p899_p0 = scmp.ne.s32.totalorder %s550_s27, %s898_s29  ;;  %p904_p2 = scmp.lt.s32.totalorder %s898_s29, %s898_s29 }
  0x81   :  { %686 = vmatprep.subr.bf16.mxu1 %v939_v0  ;;  %v696_v18 = vpack.c.bf16 %v284_v16, %v283_v15  ;;  %v285_v19 = vld [vmem:[#allocation10 + $0x10] sm:$0xff]  ;;  %v281_v21 = vsub.f32 %v124_v17, %v125_v10  ;;  %v362_v23 = vld [vmem:[#allocation11] sm:$0xff]  ;;  %v363_v24 = vld [vmem:[#allocation11 + $0x8] sm:$0xff]  ;;  %v361_v30 = vmul.f32 %v125_v10, %v124_v17 }
  0x82   :  { %v699_v22 = vpack.c.bf16 %v286_v20, %v285_v19  ;;  %v702_v26 = vpack.c.bf16 %v363_v24, %v362_v23  ;;  %v364_v27 = vld [vmem:[#allocation11 + $0x10] sm:$0xff]  ;;  %v365_v28 = vld [vmem:[#allocation11 + $0x18] sm:$0xff]  ;;  %v449_v31 = vld [vmem:[#allocation13] sm:$0xff]  ;;  %p905_p3 = por %p904_p2, %p903_p1 }
  0x83   :  { %v282_v25 = vand.u32 2147483647, %v281_v21  ;;  %v705_v29 = vpack.c.bf16 %v365_v28, %v364_v27  ;;  %v450_v32 = vld [vmem:[#allocation13 + $0x8] sm:$0xff]  ;;  %v451_v34 = vld [vmem:[#allocation13 + $0x10] sm:$0xff]  ;;  %v452_v35 = vld [vmem:[#allocation13 + $0x18] sm:$0xff] }
  0x84   :  { %688 = vmatpush3.bf16.msra.mxu1 %v687_v7  ;;  %v708_v33 = vpack.c.bf16 %v450_v32, %v449_v31  ;;  %v711_v36 = vpack.c.bf16 %v452_v35, %v451_v34  ;;  %v453_v37 = vld [vmem:[#allocation13 + $0x20] sm:$0xff]  ;;  %v454_v38 = vld [vmem:[#allocation13 + $0x28] sm:$0xff]  ;;  %v455_v40 = vld [vmem:[#allocation13 + $0x30] sm:$0xff]  ;;  %p906_p4 = pnand %p905_p3, %p899_p0 }
  0x85   :  { %689 = vmatprep.subr.bf16.mxu1 %v939_v0  ;;  %v714_v39 = vpack.c.bf16 %v454_v38, %v453_v37  ;;  %v456_v41 = vld [vmem:[#allocation13 + $0x38] sm:$0xff]  ;;  %v457_v43 = vld [vmem:[#allocation13 + $0x40] sm:$0xff]  ;;  %v458_v44 = vld [vmem:[#allocation13 + $0x48] sm:$0xff] }
  0x86   :  { %709 = vmatpush3.bf16.msra.mxu0 %v708_v33  ;;  %v717_v42 = vpack.c.bf16 %v456_v41, %v455_v40  ;;  %v720_v45 = vpack.c.bf16 %v458_v44, %v457_v43  ;;  %v459_v46 = vld [vmem:[#allocation13 + $0x50] sm:$0xff]  ;;  %v460_v47 = vld [vmem:[#allocation13 + $0x58] sm:$0xff]  ;;  %v461_v49 = vld [vmem:[#allocation13 + $0x60] sm:$0xff] }
  0x87   :  { %613 = vmatmul.mubr.msk.f32.vlgmr.msra.gmra.mrb[0].mxu1 %vm134_vm1, %v125_v10  ;;  %710 = vmatprep.subr.bf16.mxu0 %v939_v0  ;;  %v723_v48 = vpack.c.bf16 %v460_v47, %v459_v46  ;;  %v462_v50 = vld [vmem:[#allocation13 + $0x68] sm:$0xff]  ;;  %v463_v52 = vld [vmem:[#allocation13 + $0x70] sm:$0xff]  ;;  %v464_v53 = vld [vmem:[#allocation13 + $0x78] sm:$0xff] }
  0x88   :  { %691 = vmatpush3.bf16.msra.mxu1 %v690_v11  ;;  %623 = vmatprep.mubr.msk.f32.mxu1 %vm940_vm0, %v941_v1  ;;  %v726_v51 = vpack.c.bf16 %v462_v50, %v461_v49  ;;  %v729_v54 = vpack.c.bf16 %v464_v53, %v463_v52  ;;  %v566_v5 = vld [vmem:[%s1143_s8] ss:$0 sm:$0xff] }
  0x89   :  { %692 = vmatprep.subr.bf16.mxu1 %v939_v0 }
  0x8a   :  { %712 = vmatpush3.bf16.msra.mxu0 %v711_v36 }
  0x8b   :  { %713 = vmatprep.subr.bf16.mxu0 %v939_v0 }
  0x8c   :  { %694 = vmatpush3.bf16.msra.mxu1 %v693_v14 }
  0x8d   :  { %695 = vmatprep.subr.bf16.mxu1 %v939_v0 }
  0x8e   :  { %715 = vmatpush3.bf16.msra.mxu0 %v714_v39 }
  0x8f   :  { %624 = vmatmul.mubr.msk.f32.vlgmr.msra.gmra.mrb[2].mxu1 %vm134_vm1, %v124_v17  ;;  %716 = vmatprep.subr.bf16.mxu0 %v939_v0 }
  0x90   :  { %697 = vmatpush3.bf16.msra.mxu1 %v696_v18  ;;  %634 = vmatprep.mubr.msk.f32.mxu1 %vm940_vm0, %v941_v1 }
  0x91   :  { %698 = vmatprep.subr.bf16.mxu1 %v939_v0 }
  0x92   :  { %718 = vmatpush3.bf16.msra.mxu0 %v717_v42 }
  0x93   :  { %719 = vmatprep.subr.bf16.mxu0 %v939_v0 }
  0x94   :  { %700 = vmatpush3.bf16.msra.mxu1 %v699_v22 }
  0x95   :  { %701 = vmatprep.subr.bf16.mxu1 %v939_v0 }
  0x96   :  { %721 = vmatpush3.bf16.msra.mxu0 %v720_v45 }
  0x97   :  { %635 = vmatmul.mubr.msk.f32.vlgmr.msra.gmra.mrb[4].mxu1 %vm134_vm1, %v282_v25  ;;  %722 = vmatprep.subr.bf16.mxu0 %v939_v0 }
  0x98   :  { %703 = vmatpush3.bf16.msra.mxu1 %v702_v26  ;;  %645 = vmatprep.mubr.msk.f32.mxu1 %vm940_vm0, %v941_v1  ;;  %v565_v1 = vld [vmem:[%s1141_s6] ss:$0 sm:$0xff] }
  0x99   :  { %704 = vmatprep.subr.bf16.mxu1 %v939_v0 }
  0x9a   :  { %724 = vmatpush3.bf16.msra.mxu0 %v723_v48 }
  0x9b   :  { %725 = vmatprep.subr.bf16.mxu0 %v939_v0 }
  0x9c   :  { %706 = vmatpush3.bf16.msra.mxu1 %v705_v29 }
  0x9e   :  { %727 = vmatpush3.bf16.msra.mxu0 %v726_v51 }
  0x9f   :  { %646 = vmatmul.mubr.msk.f32.vlgmr.msra.gmra.mrb[6].mxu1 %vm134_vm1, %v361_v30  ;;  %728 = vmatprep.subr.bf16.mxu0 %v939_v0 }
  0xa2   :  { %730 = vmatpush3.bf16.msra.mxu0 %v729_v54 }
 0x15a   :  { %v204_v55 = vpop.f32.mrb[0].mxu1 }
 0x15b   :  { %v614_v56 = vpop.f32.mrb[1].mxu1 }
 0x162   :  { %v277_v57 = vpop.f32.mrb[2].mxu1 }
 0x163   :  { %v278_v58 = vadd.f32 %v277_v57, %v204_v55  ;;  %v625_v59 = vpop.f32.mrb[3].mxu1 }
 0x16a   :  { %v356_v60 = vpop.f32.mrb[4].mxu1 }
 0x16b   :  { %v360_v61 = vadd.f32 %v356_v60, %v278_v58  ;;  %v636_v62 = vpop.f32.mrb[5].mxu1 }
 0x172   :  { %v435_v63 = vpop.f32.mrb[6].mxu1 }
 0x173   :  { %v439_v2 = vadd.f32 %v435_v63, %v360_v61  ;;  %v647_v3 = vpop.f32.mrb[7].mxu1 }
 0x175   :  { %v447_v0 = vadd.f32 %v565_v1, %v439_v2 }
 0x177   :  { %v448_v4 = vmax.f32 %v447_v0, 0.0 }
 0x179   :  { %681 = vmatmul.mubr.f32.vlgmr.msra.gmra.mrb[0].mxu0 %v448_v4 }
 0x24c   :  { %v538_v6 = vpop.f32.mrb[0].mxu0 }
 0x24d   :  { %v539_v7 = vadd.f32 %v566_v5, %v538_v6  ;;  %v682_v8 = vpop.f32.mrb[1].mxu0 }
 0x24f   :  { %542 = vst [vmem:[#allocation14] sm:$0xff] %v539_v7 }
 0x250   :  { %909 = shalt.err (!%p906_p4)
}
 0x251   :  { %s910_s11 = scalar_lea.hbm %s1144_s9, 128 }
 0x252   :  { %p911_p5 = scmp.ne.s32.totalorder %s1144_s9, %s910_s11  ;;  %p914_p6 = scmp.lt.u32.totalorder %s910_s11, %s1144_s9 }
 0x254   :  { %p916_p7 = pnand %p914_p6, %p911_p5 }
 0x256   :  { %919 = shalt.err (!%p916_p7)
}
 0x257   :  { %552 = dma.vmem_to_hbm [thread:$0]  %s550_s27, 128, %s1144_s9, [#allocation4]  }
 0x258   :  { %928 = dma.done.wait [#allocation4], 128  }
 0x259   :  { %929 = vsyncadd [#allocation4], 4294967168 }
 0x25a   :  { %556 = vsyncpa [#allocation3], 1 }
 0x25b   :  { %557 = vsyncpa [#allocation6], 1 }
 0x25c   :  { %558 = vsyncpa [#allocation9], 1 }
 0x25d   :  { %559 = vsyncpa [#allocation12], 1 }
 0x25e   :  { %560 = vsyncpa [#allocation4], 1 }

</bundles_post_ra>
